<compile_context>
chip_gen: v7x
topology: tpu7x:2x2x1
jax: 0.10.0
libtpu: 0.0.40
codegen_flags: <defaults>
</compile_context>

<pallas_src>
import functools

import jax
import jax.numpy as jnp
from jax import lax
from jax.experimental import pallas as pl
from jax.experimental.pallas import tpu as pltpu  # noqa: F401  (TPU backend)


# --------------------------------------------------------------------------
# Fused multi-head-attention kernel (single program, everything in VMEM).
# --------------------------------------------------------------------------
def mha_kernel(x_ref, wqkv_ref, wuni_ref, buni_ref, gamma_ref, beta_ref, decay_ref,
               out_ref, *maybe_attn_ref,
               heads, dim_head, scale, batch, seq, with_attn):
    attn_ref = maybe_attn_ref[0] if with_attn else None
    D = out_ref.shape[-1]
    inner = heads * dim_head

    # One lane-dense QKV projection with batch folded into the rows:
    # bf16 [B*N, D] x bf16 [D, 3*inner] -> f32.  Leading-dim collapse only.
    x_flat = x_ref[...].reshape(batch * seq, x_ref.shape[-1])
    qkv = jnp.dot(x_flat, wqkv_ref[...], preferred_element_type=jnp.float32)

    # Hoisted: one broadcast of the time-decay row to [N, N], reused B*heads times.
    decay_b = jnp.broadcast_to(decay_ref[...], (seq, seq))

    b_uni = buni_ref[...]         # [1, D]
    gamma = gamma_ref[...]        # [1, D]
    beta = beta_ref[...]          # [1, D]

    batch_slabs = []
    for b in range(batch):                     # static unroll (tiny B)
        r0 = b * seq
        head_cols = []
        for h in range(heads):                 # static unroll (tiny #heads)
            c = h * dim_head
            qh = qkv[r0:r0 + seq, c:c + dim_head]
            kh = qkv[r0:r0 + seq, inner + c:inner + c + dim_head]
            vh = qkv[r0:r0 + seq, 2 * inner + c:2 * inner + c + dim_head]

            # scores = q @ k^T  (contract on dim_head, no explicit transpose)
            scores = lax.dot_general(qh, kh, (((1,), (1,)), ((), ())),
                                     preferred_element_type=jnp.float32) * scale
            scores = scores + decay_b                      # time-decay on key axis
            scores = scores - jnp.max(scores, axis=-1, keepdims=True)
            e = jnp.exp(scores)
            attn = e * pl.reciprocal(jnp.sum(e, axis=-1, keepdims=True), approx=True)
            if with_attn:
                attn_ref[b, h, :, :] = attn

            head_cols.append(jnp.dot(attn, vh, preferred_element_type=jnp.float32))

        # Two [N, 64] halves fill exactly one 128-lane tile -> cheap lane concat.
        batch_slabs.append(jnp.concatenate(head_cols, axis=-1))   # [N, inner]

    # Stack batches along sublanes -> [B*N, inner], then ONE unify matmul.
    ho = jnp.concatenate(batch_slabs, axis=0)
    out = jnp.dot(ho.astype(wuni_ref.dtype), wuni_ref[...],
                  preferred_element_type=jnp.float32) + b_uni      # [B*N, D]

    # LayerNorm over the feature dim, once for the whole slab (eps = 1e-5).
    mu = jnp.mean(out, axis=-1, keepdims=True)
    var = jnp.mean((out - mu) ** 2, axis=-1, keepdims=True)
    normed = (out - mu) * lax.rsqrt(var + 1e-5) * gamma + beta

    out_ref[...] = normed.reshape(batch, seq, D)   # single lane-dense full store


# --------------------------------------------------------------------------
# One-time layout prep (weight transposes, bf16 casts, decay row) + wrapper.
# --------------------------------------------------------------------------
def prepare_inputs(params, seq_len):
    """Transpose weights to [in, out] in bf16 and precompute the decay row once."""
    return dict(
        wqkv_t=jnp.transpose(params["w_qkv"]).astype(jnp.bfloat16),   # [D, 3*inner]
        wuni_t=jnp.transpose(params["w_uni"]).astype(jnp.bfloat16),   # [inner, D]
        b_uni=params["b_uni"][None, :].astype(jnp.float32),           # [1, D]
        gamma=params["gamma"][None, :].astype(jnp.float32),           # [1, D]
        beta=params["beta"][None, :].astype(jnp.float32),             # [1, D]
        decay=jnp.exp(-jnp.arange(seq_len, dtype=jnp.float32) / 50.0)[None, :],
    )


@functools.partial(jax.jit, static_argnames=("heads", "dim_head", "return_attn"))
def multi_head_attention(prep, x, *, heads, dim_head, return_attn=True):
    """x: [B, N, D] -> LayerNorm(unify(attention(x))) [B, N, D]
       (+ attention weights [B, heads, N, N] when return_attn)."""
    B, N, D = x.shape
    scale = float(dim_head) ** (-0.5)

    kernel = functools.partial(mha_kernel, heads=heads, dim_head=dim_head,
                               scale=scale, batch=B, seq=N, with_attn=return_attn)

    out_shapes = (jax.ShapeDtypeStruct((B, N, D), jnp.float32),)
    if return_attn:
        out_shapes = out_shapes + (jax.ShapeDtypeStruct((B, heads, N, N), jnp.float32),)

    # Single program, no grid: all operands are tiny and fully VMEM-resident.
    results = pl.pallas_call(
        kernel,
        out_shape=out_shapes,
    )(x.astype(jnp.bfloat16), prep["wqkv_t"], prep["wuni_t"], prep["b_uni"],
      prep["gamma"], prep["beta"], prep["decay"])

    if return_attn:
        return results[0], results[1]
    return results[0]


# --------------------------------------------------------------------------
# Pure-JAX reference (mirrors the PyTorch forward exactly).
# --------------------------------------------------------------------------
def reference_mha(params, x, *, heads, dim_head):
    B, N, D = x.shape
    inner = heads * dim_head
    scale = float(dim_head) ** (-0.5)

    qkv = x @ params["w_qkv"].T                                   # [B, N, 3*inner]
    q, k, v = jnp.split(qkv, 3, axis=-1)
    split = lambda t: jnp.transpose(t.reshape(B, N, heads, dim_head), (0, 2, 1, 3))
    q, k, v = split(q), split(k), split(v)
    scores = jnp.einsum("bhqd,bhkd->bhqk", q, k) * scale
    decay = jnp.exp(-jnp.arange(N, dtype=jnp.float32) / 50.0)
    scores = scores + decay[None, None, None, :]
    attn = jax.nn.softmax(scores, axis=-1)
    out = jnp.einsum("bhqk,bhkd->bhqd", attn, v)
    out = jnp.transpose(out, (0, 2, 1, 3)).reshape(B, N, inner)
    out = out @ params["w_uni"].T + params["b_uni"]
    mu = out.mean(-1, keepdims=True)
    var = ((out - mu) ** 2).mean(-1, keepdims=True)
    out = (out - mu) / jnp.sqrt(var + 1e-5) * params["gamma"] + params["beta"]
    return out, attn


if __name__ == "__main__":
    B, N, D = 2, 8, 128
    HEADS, DIM_HEAD = 2, 64
    INNER = HEADS * DIM_HEAD

    key = jax.random.PRNGKey(0)
    k1, k2, k3, k4, k5, kx = jax.random.split(key, 6)
    params = {
        "w_qkv": 0.1 * jax.random.normal(k1, (3 * INNER, D), jnp.float32),
        "w_uni": 0.1 * jax.random.normal(k2, (D, INNER), jnp.float32),
        "b_uni": 0.1 * jax.random.normal(k3, (D,), jnp.float32),
        "gamma": 1.0 + 0.1 * jax.random.normal(k4, (D,), jnp.float32),
        "beta": 0.1 * jax.random.normal(k5, (D,), jnp.float32),
    }
    x = jax.random.normal(kx, (B, N, D), jnp.float32)

    prep = prepare_inputs(params, N)                       # one-time layout prep

    out, attn = multi_head_attention(prep, x, heads=HEADS, dim_head=DIM_HEAD,
                                     return_attn=True)
    jax.block_until_ready((out, attn))

    # Attention-weights-free path (skips the narrow masked store entirely).
    out_noattn = multi_head_attention(prep, x, heads=HEADS, dim_head=DIM_HEAD,
                                      return_attn=False)
    jax.block_until_ready(out_noattn)

    out_ref, attn_ref = reference_mha(params, x, heads=HEADS, dim_head=DIM_HEAD)

    assert out.shape == (B, N, D)
    assert attn.shape == (B, HEADS, N, N)
    assert jnp.allclose(out, out_ref, rtol=2e-2, atol=2e-2)
    assert jnp.allclose(attn, attn_ref, rtol=2e-2, atol=2e-2)
    assert jnp.allclose(out_noattn, out, rtol=1e-6, atol=1e-6)

    print("KERNEL_OK")
</pallas_src>

<mosaic_0001>
module attributes {stable_mosaic.version = 11 : i64} {
  func.func @mha_kernel(%arg0: memref<2x8x128xbf16, #tpu.memory_space<vmem>>, %arg1: memref<128x384xbf16, #tpu.memory_space<vmem>>, %arg2: memref<128x128xbf16, #tpu.memory_space<vmem>>, %arg3: memref<1x128xf32, #tpu.memory_space<vmem>>, %arg4: memref<1x128xf32, #tpu.memory_space<vmem>>, %arg5: memref<1x128xf32, #tpu.memory_space<vmem>>, %arg6: memref<1x8xf32, #tpu.memory_space<vmem>>, %arg7: memref<2x8x128xf32, #tpu.memory_space<vmem>>, %arg8: memref<2x2x8x8xf32, #tpu.memory_space<vmem>>) attributes {dimension_semantics = [], scalar_prefetch = 0 : i64, scratch_operands = 0 : i64, tpu.core_type = #tpu.core_type<tc>} {
    %c0 = arith.constant 0 : index
    %c0_0 = arith.constant 0 : index
    %c0_1 = arith.constant 0 : index
    %0 = vector.load %arg0[%c0, %c0_0, %c0_1] : memref<2x8x128xbf16, #tpu.memory_space<vmem>>, vector<2x8x128xbf16>
    %1 = vector.shape_cast %0 : vector<2x8x128xbf16> to vector<16x128xbf16>
    %c0_2 = arith.constant 0 : index
    %c0_3 = arith.constant 0 : index
    %2 = vector.load %arg1[%c0_2, %c0_3] : memref<128x384xbf16, #tpu.memory_space<vmem>>, vector<128x384xbf16>
    %cst = arith.constant dense<0.000000e+00> : vector<16x384xf32>
    %3 = tpu.matmul %1, %2, %cst {dimension_numbers = #tpu.dot_dimension_numbers<[1], [0], [0], [1], [0, 0, 1, 1], [], []>} : vector<16x128xbf16>, vector<128x384xbf16>, vector<16x384xf32> -> vector<16x384xf32>
    %c0_4 = arith.constant 0 : index
    %c0_5 = arith.constant 0 : index
    %4 = vector.load %arg6[%c0_4, %c0_5] : memref<1x8xf32, #tpu.memory_space<vmem>>, vector<1x8xf32>
    %5 = vector.shape_cast %4 : vector<1x8xf32> to vector<1x8xf32>
    %6 = vector.broadcast %5 : vector<1x8xf32> to vector<8x8xf32>
    %c0_6 = arith.constant 0 : index
    %c0_7 = arith.constant 0 : index
    %7 = vector.load %arg3[%c0_6, %c0_7] : memref<1x128xf32, #tpu.memory_space<vmem>>, vector<1x128xf32>
    %c0_8 = arith.constant 0 : index
    %c0_9 = arith.constant 0 : index
    %8 = vector.load %arg4[%c0_8, %c0_9] : memref<1x128xf32, #tpu.memory_space<vmem>>, vector<1x128xf32>
    %c0_10 = arith.constant 0 : index
    %c0_11 = arith.constant 0 : index
    %9 = vector.load %arg5[%c0_10, %c0_11] : memref<1x128xf32, #tpu.memory_space<vmem>>, vector<1x128xf32>
    %10 = vector.extract_strided_slice %3 {offsets = [0, 0], sizes = [8, 64], strides = [1, 1]} : vector<16x384xf32> to vector<8x64xf32>
    %11 = vector.extract_strided_slice %3 {offsets = [0, 128], sizes = [8, 64], strides = [1, 1]} : vector<16x384xf32> to vector<8x64xf32>
    %12 = vector.extract_strided_slice %3 {offsets = [0, 256], sizes = [8, 64], strides = [1, 1]} : vector<16x384xf32> to vector<8x64xf32>
    %cst_12 = arith.constant dense<0.000000e+00> : vector<8x8xf32>
    %13 = tpu.matmul %10, %11, %cst_12 {dimension_numbers = #tpu.dot_dimension_numbers<[1], [1], [0], [0], [0, 0, 1, 0], [], []>} : vector<8x64xf32>, vector<8x64xf32>, vector<8x8xf32> -> vector<8x8xf32>
    %cst_13 = arith.constant 1.250000e-01 : f32
    %14 = vector.broadcast %cst_13 : f32 to vector<8x8xf32>
    %15 = arith.mulf %13, %14 : vector<8x8xf32>
    %16 = arith.addf %15, %6 : vector<8x8xf32>
    %cst_14 = arith.constant dense<0xFF800000> : vector<8xf32>
    %17 = vector.multi_reduction <maximumf>, %16, %cst_14 [1] : vector<8x8xf32> to vector<8xf32>
    %18 = vector.shape_cast %17 : vector<8xf32> to vector<8x1xf32>
    %19 = vector.broadcast %18 : vector<8x1xf32> to vector<8x8xf32>
    %20 = arith.subf %16, %19 : vector<8x8xf32>
    %21 = math.exp %20 : vector<8x8xf32>
    %cst_15 = arith.constant dense<0.000000e+00> : vector<8xf32>
    %22 = vector.multi_reduction <add>, %21, %cst_15 [1] : vector<8x8xf32> to vector<8xf32>
    %23 = vector.shape_cast %22 : vector<8xf32> to vector<8x1xf32>
    %24 = tpu.reciprocal %23 {approx = true} : vector<8x1xf32> -> vector<8x1xf32>
    %25 = vector.broadcast %24 : vector<8x1xf32> to vector<8x8xf32>
    %26 = arith.mulf %21, %25 : vector<8x8xf32>
    %c0_16 = arith.constant 0 : index
    %c0_17 = arith.constant 0 : index
    %c0_18 = arith.constant 0 : index
    %c0_19 = arith.constant 0 : index
    %27 = vector.load %arg8[%c0_16, %c0_17, %c0_18, %c0_19] : memref<2x2x8x8xf32, #tpu.memory_space<vmem>>, vector<1x1x8x8xf32>
    %28 = vector.shape_cast %27 : vector<1x1x8x8xf32> to vector<8x8xf32>
    %29 = vector.shape_cast %26 : vector<8x8xf32> to vector<1x1x8x8xf32>
    tpu.vector_store %arg8[%c0_16, %c0_17, %c0_18, %c0_19], %29 {strides = array<i32>} : memref<2x2x8x8xf32, #tpu.memory_space<vmem>>, vector<1x1x8x8xf32>,
    %cst_20 = arith.constant dense<0.000000e+00> : vector<8x64xf32>
    %30 = tpu.matmul %26, %12, %cst_20 {dimension_numbers = #tpu.dot_dimension_numbers<[1], [0], [0], [1], [0, 0, 1, 1], [], []>} : vector<8x8xf32>, vector<8x64xf32>, vector<8x64xf32> -> vector<8x64xf32>
    %31 = vector.extract_strided_slice %3 {offsets = [0, 64], sizes = [8, 64], strides = [1, 1]} : vector<16x384xf32> to vector<8x64xf32>
    %32 = vector.extract_strided_slice %3 {offsets = [0, 192], sizes = [8, 64], strides = [1, 1]} : vector<16x384xf32> to vector<8x64xf32>
    %33 = vector.extract_strided_slice %3 {offsets = [0, 320], sizes = [8, 64], strides = [1, 1]} : vector<16x384xf32> to vector<8x64xf32>
    %cst_21 = arith.constant dense<0.000000e+00> : vector<8x8xf32>
    %34 = tpu.matmul %31, %32, %cst_21 {dimension_numbers = #tpu.dot_dimension_numbers<[1], [1], [0], [0], [0, 0, 1, 0], [], []>} : vector<8x64xf32>, vector<8x64xf32>, vector<8x8xf32> -> vector<8x8xf32>
    %cst_22 = arith.constant 1.250000e-01 : f32
    %35 = vector.broadcast %cst_22 : f32 to vector<8x8xf32>
    %36 = arith.mulf %34, %35 : vector<8x8xf32>
    %37 = arith.addf %36, %6 : vector<8x8xf32>
    %cst_23 = arith.constant dense<0xFF800000> : vector<8xf32>
    %38 = vector.multi_reduction <maximumf>, %37, %cst_23 [1] : vector<8x8xf32> to vector<8xf32>
    %39 = vector.shape_cast %38 : vector<8xf32> to vector<8x1xf32>
    %40 = vector.broadcast %39 : vector<8x1xf32> to vector<8x8xf32>
    %41 = arith.subf %37, %40 : vector<8x8xf32>
    %42 = math.exp %41 : vector<8x8xf32>
    %cst_24 = arith.constant dense<0.000000e+00> : vector<8xf32>
    %43 = vector.multi_reduction <add>, %42, %cst_24 [1] : vector<8x8xf32> to vector<8xf32>
    %44 = vector.shape_cast %43 : vector<8xf32> to vector<8x1xf32>
    %45 = tpu.reciprocal %44 {approx = true} : vector<8x1xf32> -> vector<8x1xf32>
    %46 = vector.broadcast %45 : vector<8x1xf32> to vector<8x8xf32>
    %47 = arith.mulf %42, %46 : vector<8x8xf32>
    %c0_25 = arith.constant 0 : index
    %c1 = arith.constant 1 : index
    %c0_26 = arith.constant 0 : index
    %c0_27 = arith.constant 0 : index
    %48 = vector.load %arg8[%c0_25, %c1, %c0_26, %c0_27] : memref<2x2x8x8xf32, #tpu.memory_space<vmem>>, vector<1x1x8x8xf32>
    %49 = vector.shape_cast %48 : vector<1x1x8x8xf32> to vector<8x8xf32>
    %50 = vector.shape_cast %47 : vector<8x8xf32> to vector<1x1x8x8xf32>
    tpu.vector_store %arg8[%c0_25, %c1, %c0_26, %c0_27], %50 {strides = array<i32>} : memref<2x2x8x8xf32, #tpu.memory_space<vmem>>, vector<1x1x8x8xf32>,
    %cst_28 = arith.constant dense<0.000000e+00> : vector<8x64xf32>
    %51 = tpu.matmul %47, %33, %cst_28 {dimension_numbers = #tpu.dot_dimension_numbers<[1], [0], [0], [1], [0, 0, 1, 1], [], []>} : vector<8x8xf32>, vector<8x64xf32>, vector<8x64xf32> -> vector<8x64xf32>
    %52 = tpu.concatenate %30, %51 in 1 : vector<8x64xf32>, vector<8x64xf32> -> vector<8x128xf32>
    %53 = vector.extract_strided_slice %3 {offsets = [8, 0], sizes = [8, 64], strides = [1, 1]} : vector<16x384xf32> to vector<8x64xf32>
    %54 = vector.extract_strided_slice %3 {offsets = [8, 128], sizes = [8, 64], strides = [1, 1]} : vector<16x384xf32> to vector<8x64xf32>
    %55 = vector.extract_strided_slice %3 {offsets = [8, 256], sizes = [8, 64], strides = [1, 1]} : vector<16x384xf32> to vector<8x64xf32>
    %cst_29 = arith.constant dense<0.000000e+00> : vector<8x8xf32>
    %56 = tpu.matmul %53, %54, %cst_29 {dimension_numbers = #tpu.dot_dimension_numbers<[1], [1], [0], [0], [0, 0, 1, 0], [], []>} : vector<8x64xf32>, vector<8x64xf32>, vector<8x8xf32> -> vector<8x8xf32>
    %cst_30 = arith.constant 1.250000e-01 : f32
    %57 = vector.broadcast %cst_30 : f32 to vector<8x8xf32>
    %58 = arith.mulf %56, %57 : vector<8x8xf32>
    %59 = arith.addf %58, %6 : vector<8x8xf32>
    %cst_31 = arith.constant dense<0xFF800000> : vector<8xf32>
    %60 = vector.multi_reduction <maximumf>, %59, %cst_31 [1] : vector<8x8xf32> to vector<8xf32>
    %61 = vector.shape_cast %60 : vector<8xf32> to vector<8x1xf32>
    %62 = vector.broadcast %61 : vector<8x1xf32> to vector<8x8xf32>
    %63 = arith.subf %59, %62 : vector<8x8xf32>
    %64 = math.exp %63 : vector<8x8xf32>
    %cst_32 = arith.constant dense<0.000000e+00> : vector<8xf32>
    %65 = vector.multi_reduction <add>, %64, %cst_32 [1] : vector<8x8xf32> to vector<8xf32>
    %66 = vector.shape_cast %65 : vector<8xf32> to vector<8x1xf32>
    %67 = tpu.reciprocal %66 {approx = true} : vector<8x1xf32> -> vector<8x1xf32>
    %68 = vector.broadcast %67 : vector<8x1xf32> to vector<8x8xf32>
    %69 = arith.mulf %64, %68 : vector<8x8xf32>
    %c1_33 = arith.constant 1 : index
    %c0_34 = arith.constant 0 : index
    %c0_35 = arith.constant 0 : index
    %c0_36 = arith.constant 0 : index
    %70 = vector.load %arg8[%c1_33, %c0_34, %c0_35, %c0_36] : memref<2x2x8x8xf32, #tpu.memory_space<vmem>>, vector<1x1x8x8xf32>
    %71 = vector.shape_cast %70 : vector<1x1x8x8xf32> to vector<8x8xf32>
    %72 = vector.shape_cast %69 : vector<8x8xf32> to vector<1x1x8x8xf32>
    tpu.vector_store %arg8[%c1_33, %c0_34, %c0_35, %c0_36], %72 {strides = array<i32>} : memref<2x2x8x8xf32, #tpu.memory_space<vmem>>, vector<1x1x8x8xf32>,
    %cst_37 = arith.constant dense<0.000000e+00> : vector<8x64xf32>
    %73 = tpu.matmul %69, %55, %cst_37 {dimension_numbers = #tpu.dot_dimension_numbers<[1], [0], [0], [1], [0, 0, 1, 1], [], []>} : vector<8x8xf32>, vector<8x64xf32>, vector<8x64xf32> -> vector<8x64xf32>
    %74 = vector.extract_strided_slice %3 {offsets = [8, 64], sizes = [8, 64], strides = [1, 1]} : vector<16x384xf32> to vector<8x64xf32>
    %75 = vector.extract_strided_slice %3 {offsets = [8, 192], sizes = [8, 64], strides = [1, 1]} : vector<16x384xf32> to vector<8x64xf32>
    %76 = vector.extract_strided_slice %3 {offsets = [8, 320], sizes = [8, 64], strides = [1, 1]} : vector<16x384xf32> to vector<8x64xf32>
    %cst_38 = arith.constant dense<0.000000e+00> : vector<8x8xf32>
    %77 = tpu.matmul %74, %75, %cst_38 {dimension_numbers = #tpu.dot_dimension_numbers<[1], [1], [0], [0], [0, 0, 1, 0], [], []>} : vector<8x64xf32>, vector<8x64xf32>, vector<8x8xf32> -> vector<8x8xf32>
    %cst_39 = arith.constant 1.250000e-01 : f32
    %78 = vector.broadcast %cst_39 : f32 to vector<8x8xf32>
    %79 = arith.mulf %77, %78 : vector<8x8xf32>
    %80 = arith.addf %79, %6 : vector<8x8xf32>
    %cst_40 = arith.constant dense<0xFF800000> : vector<8xf32>
    %81 = vector.multi_reduction <maximumf>, %80, %cst_40 [1] : vector<8x8xf32> to vector<8xf32>
    %82 = vector.shape_cast %81 : vector<8xf32> to vector<8x1xf32>
    %83 = vector.broadcast %82 : vector<8x1xf32> to vector<8x8xf32>
    %84 = arith.subf %80, %83 : vector<8x8xf32>
    %85 = math.exp %84 : vector<8x8xf32>
    %cst_41 = arith.constant dense<0.000000e+00> : vector<8xf32>
    %86 = vector.multi_reduction <add>, %85, %cst_41 [1] : vector<8x8xf32> to vector<8xf32>
    %87 = vector.shape_cast %86 : vector<8xf32> to vector<8x1xf32>
    %88 = tpu.reciprocal %87 {approx = true} : vector<8x1xf32> -> vector<8x1xf32>
    %89 = vector.broadcast %88 : vector<8x1xf32> to vector<8x8xf32>
    %90 = arith.mulf %85, %89 : vector<8x8xf32>
    %c1_42 = arith.constant 1 : index
    %c1_43 = arith.constant 1 : index
    %c0_44 = arith.constant 0 : index
    %c0_45 = arith.constant 0 : index
    %91 = vector.load %arg8[%c1_42, %c1_43, %c0_44, %c0_45] : memref<2x2x8x8xf32, #tpu.memory_space<vmem>>, vector<1x1x8x8xf32>
    %92 = vector.shape_cast %91 : vector<1x1x8x8xf32> to vector<8x8xf32>
    %93 = vector.shape_cast %90 : vector<8x8xf32> to vector<1x1x8x8xf32>
    tpu.vector_store %arg8[%c1_42, %c1_43, %c0_44, %c0_45], %93 {strides = array<i32>} : memref<2x2x8x8xf32, #tpu.memory_space<vmem>>, vector<1x1x8x8xf32>,
    %cst_46 = arith.constant dense<0.000000e+00> : vector<8x64xf32>
    %94 = tpu.matmul %90, %76, %cst_46 {dimension_numbers = #tpu.dot_dimension_numbers<[1], [0], [0], [1], [0, 0, 1, 1], [], []>} : vector<8x8xf32>, vector<8x64xf32>, vector<8x64xf32> -> vector<8x64xf32>
    %95 = tpu.concatenate %73, %94 in 1 : vector<8x64xf32>, vector<8x64xf32> -> vector<8x128xf32>
    %96 = tpu.concatenate %52, %95 in 0 : vector<8x128xf32>, vector<8x128xf32> -> vector<16x128xf32>
    %97 = arith.truncf %96 : vector<16x128xf32> to vector<16x128xbf16>
    %c0_47 = arith.constant 0 : index
    %c0_48 = arith.constant 0 : index
    %98 = vector.load %arg2[%c0_47, %c0_48] : memref<128x128xbf16, #tpu.memory_space<vmem>>, vector<128x128xbf16>
    %cst_49 = arith.constant dense<0.000000e+00> : vector<16x128xf32>
    %99 = tpu.matmul %97, %98, %cst_49 {dimension_numbers = #tpu.dot_dimension_numbers<[1], [0], [0], [1], [0, 0, 1, 1], [], []>} : vector<16x128xbf16>, vector<128x128xbf16>, vector<16x128xf32> -> vector<16x128xf32>
    %100 = vector.broadcast %7 : vector<1x128xf32> to vector<16x128xf32>
    %101 = arith.addf %99, %100 : vector<16x128xf32>
    %cst_50 = arith.constant dense<0.000000e+00> : vector<16xf32>
    %102 = vector.multi_reduction <add>, %101, %cst_50 [1] : vector<16x128xf32> to vector<16xf32>
    %103 = vector.shape_cast %102 : vector<16xf32> to vector<16x1xf32>
    %cst_51 = arith.constant 1.280000e+02 : f32
    %104 = vector.broadcast %cst_51 : f32 to vector<16x1xf32>
    %105 = arith.divf %103, %104 : vector<16x1xf32>
    %106 = vector.broadcast %105 : vector<16x1xf32> to vector<16x128xf32>
    %107 = arith.subf %101, %106 : vector<16x128xf32>
    %108 = arith.mulf %107, %107 : vector<16x128xf32>
    %cst_52 = arith.constant dense<0.000000e+00> : vector<16xf32>
    %109 = vector.multi_reduction <add>, %108, %cst_52 [1] : vector<16x128xf32> to vector<16xf32>
    %110 = vector.shape_cast %109 : vector<16xf32> to vector<16x1xf32>
    %cst_53 = arith.constant 1.280000e+02 : f32
    %111 = vector.broadcast %cst_53 : f32 to vector<16x1xf32>
    %112 = arith.divf %110, %111 : vector<16x1xf32>
    %113 = vector.broadcast %105 : vector<16x1xf32> to vector<16x128xf32>
    %114 = arith.subf %101, %113 : vector<16x128xf32>
    %cst_54 = arith.constant 9.99999974E-6 : f32
    %115 = vector.broadcast %cst_54 : f32 to vector<16x1xf32>
    %116 = arith.addf %112, %115 : vector<16x1xf32>
    %117 = math.rsqrt %116 : vector<16x1xf32>
    %118 = vector.broadcast %117 : vector<16x1xf32> to vector<16x128xf32>
    %119 = arith.mulf %114, %118 : vector<16x128xf32>
    %120 = vector.broadcast %8 : vector<1x128xf32> to vector<16x128xf32>
    %121 = arith.mulf %119, %120 : vector<16x128xf32>
    %122 = vector.broadcast %9 : vector<1x128xf32> to vector<16x128xf32>
    %123 = arith.addf %121, %122 : vector<16x128xf32>
    %124 = vector.shape_cast %123 : vector<16x128xf32> to vector<2x8x128xf32>
    %c0_55 = arith.constant 0 : index
    %c0_56 = arith.constant 0 : index
    %c0_57 = arith.constant 0 : index
    %125 = vector.load %arg7[%c0_55, %c0_56, %c0_57] : memref<2x8x128xf32, #tpu.memory_space<vmem>>, vector<2x8x128xf32>
    tpu.vector_store %arg7[%c0_55, %c0_56, %c0_57], %124 {strides = array<i32>} : memref<2x8x128xf32, #tpu.memory_space<vmem>>, vector<2x8x128xf32>,
    return
  }
}

</mosaic_0001>

<bundles_post_ra>
// kernel: multi_head_attention.1
= control target key start
LH: loop header
LB: loop body
LE: loop exit
PB: predicated region body
PF: predicated region fallthrough
CT: control target
= control target key end

     0   :  { %14 = vsyncpa [#allocation3], 0  ;;  %s1755_s0 = inlined_call_operand.vmem [shape: bf16[2,8,128], index: 0, kind: input, shape index: {}]   ;;  %s1756_s1 = inlined_call_operand.hbm [shape: bf16[128,384], index: 1, kind: input, shape index: {}]   ;;  %s1757_s2 = inlined_call_operand.hbm [shape: bf16[128,128], index: 2, kind: input, shape index: {}]   ;;  %s1758_s3 = inlined_call_operand.vmem [shape: f32[1,128], index: 3, kind: input, shape index: {}]   ;;  %s1759_s4 = inlined_call_operand.vmem [shape: f32[1,128], index: 4, kind: input, shape index: {}]   ;;  %s1760_s5 = inlined_call_operand.vmem [shape: f32[1,128], index: 5, kind: input, shape index: {}]   ;;  %s1761_s6 = inlined_call_operand.vmem [shape: f32[1,8], index: 6, kind: input, shape index: {}]   ;;  %s1762_s7 = inlined_call_operand.hbm [shape: f32[2,8,128], index: 7, kind: output, shape index: {0}]   ;;  %s1763_s8 = inlined_call_operand.hbm [shape: f32[2,2,8,8], index: 8, kind: output, shape index: {1}]  }
   0x1   :  { %15 = vsyncpa [#allocation6], 0 }
   0x2   :  { %16 = vsyncpa [#allocation4], 0 }
   0x3   :  { %17 = vsyncpa [#allocation9], 0  ;;  %s1525_s27 = smov [#allocation2]   ;;  %s1429_s9 = scalar_lea.hbm %s1756_s1, 3072 }
   0x4   :  { %s25_s28 = sshll.u32 %s1525_s27, 4  ;;  %p1430_p0 = scmp.ne.s32.totalorder %s1756_s1, %s1429_s9  ;;  %s26_s28 = int_to_ptr.vmem [resolvable:$true] %s25_s28 }
   0x5   :  { %p1433_p1 = scmp.lt.u32.totalorder %s1429_s9, %s1756_s1 }
   0x7   :  { %p1435_p2 = pnand %p1433_p1, %p1430_p0 }
   0x9   :  { %1438 = shalt.err (!%p1435_p2)
}
   0xa   :  { %s1439_s14 = scalar_lea.vmem %s26_s28, 3072  ;;  %p1444_p4 = scmp.lt.s32.totalorder %s26_s28, %s26_s28 }
   0xb   :  { %p1440_p3 = scmp.ne.s32.totalorder %s26_s28, %s1439_s14  ;;  %p1445_p5 = scmp.lt.s32.totalorder %s1439_s14, %s1439_s14 }
   0xd   :  { %p1446_p6 = por %p1445_p5, %p1444_p4 }
   0xf   :  { %p1447_p7 = pnand %p1446_p6, %p1440_p3 }
  0x11   :  { %1450 = shalt.err (!%p1447_p7)
}
  0x12   :  { %s1526_s15 = smov 192   ;;  %s1527_s16 = smov 12  }
  0x13   :  { %31 = dma.hbm_to_vmem [thread:$0]  %s1756_s1, 3072, %s26_s28, [#allocation3], %s1526_s15, %s1526_s15, %s1527_s16  }
  0x14   :  { %s1528_s19 = smov [#allocation5]   ;;  %s1451_s23 = scalar_lea.hbm %s1757_s2, 1024 }
  0x15   :  { %s37_s20 = sshll.u32 %s1528_s19, 4  ;;  %p1452_p8 = scmp.ne.s32.totalorder %s1757_s2, %s1451_s23  ;;  %s38_s20 = int_to_ptr.vmem [resolvable:$true] %s37_s20 }
  0x16   :  { %p1455_p9 = scmp.lt.u32.totalorder %s1451_s23, %s1757_s2 }
  0x18   :  { %p1457_p10 = pnand %p1455_p9, %p1452_p8 }
  0x1a   :  { %1460 = shalt.err (!%p1457_p10)
}
  0x1b   :  { %s1461_s29 = scalar_lea.vmem %s38_s20, 1024  ;;  %p1466_p12 = scmp.lt.s32.totalorder %s38_s20, %s38_s20 }
  0x1c   :  { %p1462_p11 = scmp.ne.s32.totalorder %s38_s20, %s1461_s29  ;;  %p1467_p13 = scmp.lt.s32.totalorder %s1461_s29, %s1461_s29 }
  0x1e   :  { %p1468_p0 = por %p1467_p13, %p1466_p12 }
  0x20   :  { %p1469_p1 = pnand %p1468_p0, %p1462_p11 }
  0x22   :  { %1472 = shalt.err (!%p1469_p1)
}
  0x23   :  { %s1529_s1 = smov 64   ;;  %s1530_s28 = smov 4  }
  0x24   :  { %43 = dma.hbm_to_vmem [thread:$0]  %s1757_s2, 1024, %s38_s20, [#allocation6], %s1529_s1, %s1529_s1, %s1530_s28  }
  0x25   :  { %1517 = dma.done.wait [#allocation3], 3072  }
  0x26   :  { %1518 = vsyncadd [#allocation3], 4294964224 }
  0x27   :  { %1519 = dma.done.wait [#allocation6], 1024  }
  0x28   :  { %1520 = vsyncadd [#allocation6], 4294966272  ;;  %v1531_v0 = vmov 0   ;;  %v1368_v1 = vld [vmem:[#allocation2 + $0x4] ss:$12 sps:$4 sm:$0xff]   ;;  %v1532_v18 = vmov 0.0  }
  0x29   :  { %259 = vmatprep.mubr.bf16.mxu1 %v1531_v0  ;;  %v1370_v2 = vld [vmem:[#allocation2] ss:$12 sps:$4 sm:$0xff]   ;;  %227 = vmatprep.subr.bf16.mxu1 %v1368_v1  ;;  %v1371_v3 = vld [vmem:[#allocation2 + $0x1c] ss:$12 sps:$4 sm:$0xff]   ;;  %v1373_v4 = vld [vmem:[#allocation2 + $0x18] ss:$12 sps:$4 sm:$0xff]  }
  0x2a   :  { %228 = vmatpush1.bf16.msra.mxu1 %v1370_v2  ;;  %v1374_v5 = vld [vmem:[#allocation2 + $0x34] ss:$12 sps:$4 sm:$0xff]   ;;  %v1376_v6 = vld [vmem:[#allocation2 + $0x30] ss:$12 sps:$4 sm:$0xff]   ;;  %v1377_v7 = vld [vmem:[#allocation2 + $0x4c] ss:$12 sps:$4 sm:$0xff]   ;;  %1290 = vmatprep.subr.mxu0 %v1532_v18 }
  0x2b   :  { %229 = vmatprep.subr.bf16.mxu1 %v1371_v3  ;;  %v1379_v8 = vld [vmem:[#allocation2 + $0x48] ss:$12 sps:$4 sm:$0xff]   ;;  %v1380_v9 = vld [vmem:[#allocation2 + $0x64] ss:$12 sps:$4 sm:$0xff]   ;;  %v1382_v10 = vld [vmem:[#allocation2 + $0x60] ss:$12 sps:$4 sm:$0xff]  }
  0x2c   :  { %v1383_v11 = vld [vmem:[#allocation2 + $0x7c] ss:$12 sps:$4 sm:$0xff]   ;;  %v1385_v12 = vld [vmem:[#allocation2 + $0x78] ss:$12 sps:$4 sm:$0xff]   ;;  %v1386_v13 = vld [vmem:[#allocation2 + $0x94] ss:$12 sps:$4 sm:$0xff]  }
  0x2d   :  { %v1388_v14 = vld [vmem:[#allocation2 + $0x90] ss:$12 sps:$4 sm:$0xff]   ;;  %v1389_v15 = vld [vmem:[#allocation2 + $0xac] ss:$12 sps:$4 sm:$0xff]   ;;  %v1391_v16 = vld [vmem:[#allocation2 + $0xa8] ss:$12 sps:$4 sm:$0xff]  }
  0x2e   :  { %230 = vmatpush1.bf16.msra.mxu1 %v1373_v4  ;;  %v1392_v17 = vld [vmem:[%s1755_s0] sm:$0xff]   ;;  %vm1533_vm0 = vmmov 0   ;;  %vm321_vm1 = vcmask 523264   ;;  %v1393_v23 = vld [vmem:[#allocation2 + $0x8] ss:$12 sps:$4 sm:$0xff]   ;;  %vm400_vm2 = vcmask 64512  }
  0x2f   :  { %231 = vmatprep.subr.bf16.mxu1 %v1374_v5  ;;  %1292 = vmatprep.mubr.msk.f32.mxu0 %vm1533_vm0, %v1532_v18  ;;  %v1394_v24 = vld [vmem:[#allocation2 + $0x20] ss:$12 sps:$4 sm:$0xff]   ;;  %v1395_v25 = vld [vmem:[#allocation2 + $0x38] ss:$12 sps:$4 sm:$0xff]   ;;  %v1396_v26 = vld [vmem:[#allocation2 + $0x50] ss:$12 sps:$4 sm:$0xff]  }
  0x30   :  { %v1397_v27 = vld [vmem:[#allocation2 + $0x68] ss:$12 sps:$4 sm:$0xff]   ;;  %v1398_v28 = vld [vmem:[#allocation2 + $0x80] ss:$12 sps:$4 sm:$0xff]   ;;  %v1399_v29 = vld [vmem:[#allocation2 + $0x98] ss:$12 sps:$4 sm:$0xff]  }
  0x31   :  { %v1400_v30 = vld [vmem:[#allocation2 + $0xb0] ss:$12 sps:$4 sm:$0xff]   ;;  %v1639_v32 = vld [vmem:[%s1761_s6] ss:$0 sm:$0xff]  ;;  %s1534_s13 = smov [#allocation8]  }
  0x32   :  { %232 = vmatpush1.bf16.msra.mxu1 %v1376_v6 }
  0x33   :  { %233 = vmatprep.subr.bf16.mxu1 %v1377_v7 }
  0x36   :  { %234 = vmatpush1.bf16.msra.mxu1 %v1379_v8 }
  0x37   :  { %235 = vmatprep.subr.bf16.mxu1 %v1380_v9 }
  0x3a   :  { %236 = vmatpush1.bf16.msra.mxu1 %v1382_v10 }
  0x3b   :  { %237 = vmatprep.subr.bf16.mxu1 %v1383_v11 }
  0x3e   :  { %238 = vmatpush1.bf16.msra.mxu1 %v1385_v12 }
  0x3f   :  { %239 = vmatprep.subr.bf16.mxu1 %v1386_v13 }
  0x42   :  { %240 = vmatpush1.bf16.msra.mxu1 %v1388_v14 }
  0x43   :  { %241 = vmatprep.subr.bf16.mxu1 %v1389_v15 }
  0x46   :  { %242 = vmatpush1.bf16.msra.mxu1 %v1391_v16 }
  0x47   :  { %1270 = vmatprep.subr.bf16.mxu1 %v1532_v18 }
  0x49   :  { %260 = vmatmul.mubr.bf16.vlgmr.msra.gmra.mrb[0].mxu1 %v1392_v17 }
  0x4a   :  { %1286 = vmatprep.mubr.msk.bf16.mxu1 %vm1533_vm0, %v1532_v18  ;;  %1271 = vmatpush3.bf16.msra.mxu1 %v1393_v23 }
  0x4b   :  { %1272 = vmatprep.subr.bf16.mxu1 %v1532_v18 }
  0x4e   :  { %1273 = vmatpush3.bf16.msra.mxu1 %v1394_v24 }
  0x4f   :  { %1274 = vmatprep.subr.bf16.mxu1 %v1532_v18 }
  0x52   :  { %1275 = vmatpush3.bf16.msra.mxu1 %v1395_v25 }
  0x53   :  { %1276 = vmatprep.subr.bf16.mxu1 %v1532_v18 }
  0x56   :  { %1277 = vmatpush3.bf16.msra.mxu1 %v1396_v26 }
  0x57   :  { %1278 = vmatprep.subr.bf16.mxu1 %v1532_v18 }
  0x5a   :  { %1279 = vmatpush3.bf16.msra.mxu1 %v1397_v27 }
  0x5b   :  { %1280 = vmatprep.subr.bf16.mxu1 %v1532_v18 }
  0x5e   :  { %1281 = vmatpush3.bf16.msra.mxu1 %v1398_v28 }
  0x5f   :  { %1282 = vmatprep.subr.bf16.mxu1 %v1532_v18 }
  0x62   :  { %1283 = vmatpush3.bf16.msra.mxu1 %v1399_v29 }
  0x63   :  { %1284 = vmatprep.subr.bf16.mxu1 %v1532_v18 }
  0x66   :  { %1285 = vmatpush3.bf16.msra.mxu1 %v1400_v30 }
  0x69   :  { %1287 = vmatmul.mubr.bf16.vlgmr.msra.gmra.mrb[4].mxu1 %v1392_v17 }
 0x11c   :  { %v261_v19 = vpop.f32.mrb[0].mxu1 }
 0x11d   :  { %v263_v20 = vpop.f32.mrb[1].mxu1 }
 0x11e   :  { %488 = vrot.lane.b32.xlu1 %v263_v20, %s1529_s1  ;;  %v1619_v21 = vpop.f32.mrb[2].mxu1  ;;  %1291 = vmatpush3.xpose.msk.msra.mxu0 %vm321_vm1, %v263_v20 }
 0x11f   :  { %v1622_v22 = vpop.f32.mrb[3].mxu1  ;;  %1295 = vmatprep.subr.mxu0 %v1532_v18 }
 0x121   :  { %1293 = vmatmul.mubr.msk.f32.vlgmr.msra.gmra.mrb[0].mxu0 %vm321_vm1, %v261_v19 }
 0x122   :  { %486 = vrot.lane.b32.xlu1 %v261_v19, %s1529_s1  ;;  %1297 = vmatprep.mubr.msk.f32.mxu0 %vm1533_vm0, %v1532_v18 }
 0x13c   :  { %v304_v42 = vpop.f32.mrb[4].mxu1 }
 0x13d   :  { %v1288_v43 = vpop.f32.mrb[5].mxu1  ;;  %1296 = vmatpush3.msra.mxu0 %v304_v42 }
 0x13e   :  { %v1644_v44 = vpop.f32.mrb[6].mxu1  ;;  %1300 = vmatprep.subr.mxu0 %v1532_v18  ;;  %v1407_v43 = vld [vmem:[#allocation5 + $0x30] sm:$0xff]  }
 0x13f   :  { %v1289_v45 = vpop.f32.mrb[7].mxu1 }
 0x190   :  { %v489_v48 = vpop.permute.xlu1 %488 }
 0x194   :  { %v487_v50 = vpop.permute.xlu1 %486 }
 0x1f4   :  { %v394_v31 = vpop.f32.mrb[0].mxu0 }
 0x1f5   :  { %v398_v33 = vmul.f32 0.125, %v394_v31  ;;  %v1294_v34 = vpop.f32.mrb[1].mxu0 }
 0x1f7   :  { %v399_v35 = vadd.f32 %v1639_v32, %v398_v33 }
 0x1f9   :  { %v401_v36 = vsel %vm400_vm2, %v399_v35, -inf }
 0x1fa   :  { %402 = vmax.xlane.f32.xlu0 %v401_v36 }
 0x287   :  { %v403_v37 = vpop.xlane.xlu0 %402 }
 0x288   :  { %v404_v38 = vsub.f32 %v399_v35, %v403_v37  ;;  %v1401_v37 = vld [vmem:[#allocation5] sm:$0xff]  }
 0x28a   :  { %v405_v39 = vmul.f32 1.442695, %v404_v38  ;;  %v1402_v38 = vld [vmem:[#allocation5 + $0x8] sm:$0xff]  }
 0x28c   :  { %1409 = vpow2.f32 %v405_v39  ;;  %v1403_v39 = vld [vmem:[#allocation5 + $0x10] sm:$0xff]  }
 0x296   :  { %v1410_v40 = vpop.eup %1409 }
 0x297   :  { %v407_v41 = vsel %vm400_vm2, %v1410_v40, 0.0 }
 0x298   :  { %408 = vadd.xlane.f32.xlu0 %v407_v41  ;;  %v1405_v41 = vld [vmem:[#allocation5 + $0x20] sm:$0xff]  }
 0x325   :  { %v409_v46 = vpop.xlane.xlu0 %408 }
 0x326   :  { %1411 = vrcp.f32 %v409_v46 }
 0x330   :  { %v1412_v47 = vpop.eup %1411 }
 0x331   :  { %v411_v49 = vmul.f32 %v1412_v47, %v1410_v40  ;;  %v1404_v40 = vld [vmem:[#allocation5 + $0x18] sm:$0xff]  }
 0x333   :  { %412 = vst.msk [vmem:[#allocation8] sm:$0xff] %vm400_vm2, %v411_v49  ;;  %1298 = vmatmul.mubr.msk.f32.vlgmr.msra.gmra.mrb[2].mxu0 %vm400_vm2, %v411_v49 }
 0x334   :  { %1301 = vmatpush3.xpose.msk.msra.mxu0 %vm321_vm1, %v489_v48  ;;  %1302 = vmatprep.mubr.msk.f32.mxu0 %vm1533_vm0, %v1532_v18 }
 0x335   :  { %1305 = vmatprep.subr.mxu0 %v1532_v18 }
 0x337   :  { %1303 = vmatmul.mubr.msk.f32.vlgmr.msra.gmra.mrb[4].mxu0 %vm321_vm1, %v487_v50 }
 0x338   :  { %1307 = vmatprep.mubr.msk.f32.mxu0 %vm1533_vm0, %v1532_v18 }
 0x406   :  { %v1656_v51 = vpop.f32.mrb[2].mxu0 }
 0x407   :  { %v1299_v52 = vpop.f32.mrb[3].mxu0 }
 0x40a   :  { %v560_v53 = vpop.f32.mrb[4].mxu0 }
 0x40b   :  { %v564_v54 = vmul.f32 0.125, %v560_v53  ;;  %v1304_v55 = vpop.f32.mrb[5].mxu0 }
 0x40d   :  { %v565_v56 = vadd.f32 %v1639_v32, %v564_v54 }
 0x40f   :  { %v566_v57 = vsel %vm400_vm2, %v565_v56, -inf }
 0x410   :  { %567 = vmax.xlane.f32.xlu0 %v566_v57 }
 0x426   :  { %580 = vrot.lane.b32.xlu0 %v304_v42, %s1529_s1  ;;  %v1406_v42 = vld [vmem:[#allocation5 + $0x28] sm:$0xff]  }
 0x49d   :  { %v568_v58 = vpop.xlane.xlu0 %567 }
 0x49e   :  { %v569_v59 = vsub.f32 %v565_v56, %v568_v58 }
 0x4a0   :  { %v570_v60 = vmul.f32 1.442695, %v569_v59 }
 0x4a1   :  { %v581_v61 = vpop.permute.xlu0 %580 }
 0x4a2   :  { %1413 = vpow2.f32 %v570_v60  ;;  %1306 = vmatpush3.msra.mxu0 %v581_v61 }
 0x4a3   :  { %1310 = vmatprep.subr.mxu0 %v1532_v18 }
 0x4ac   :  { %v1414_v62 = vpop.eup %1413 }
 0x4ad   :  { %v572_v63 = vsel %vm400_vm2, %v1414_v62, 0.0 }
 0x4ae   :  { %573 = vadd.xlane.f32.xlu1 %v572_v63 }
 0x53b   :  { %v574_v0 = vpop.xlane.xlu1 %573 }
 0x53c   :  { %1415 = vrcp.f32 %v574_v0 }
 0x546   :  { %v1416_v1 = vpop.eup %1415 }
 0x547   :  { %v576_v2 = vmul.f32 %v1416_v1, %v1414_v62 }
 0x549   :  { %578 = vst.msk [vmem:[#allocation8 + $0x8] sm:$0xff] %vm400_vm2, %v576_v2  ;;  %1308 = vmatmul.mubr.msk.f32.vlgmr.msra.gmra.mrb[6].mxu0 %vm400_vm2, %v576_v2 }
 0x54a   :  { %1311 = vmatpush3.xpose.msk.msra.mxu0 %vm321_vm1, %v1622_v22  ;;  %1312 = vmatprep.mubr.msk.f32.mxu0 %vm1533_vm0, %v1532_v18 }
 0x54b   :  { %1315 = vmatprep.subr.mxu0 %v1532_v18 }
 0x54d   :  { %1313 = vmatmul.mubr.msk.f32.vlgmr.msra.gmra.mrb[8].mxu0 %vm321_vm1, %v1619_v21 }
 0x54e   :  { %1316 = vmatpush3.msra.mxu0 %v1644_v44  ;;  %1317 = vmatprep.mubr.msk.f32.mxu0 %vm1533_vm0, %v1532_v18 }
 0x54f   :  { %1320 = vmatprep.subr.mxu0 %v1532_v18 }
 0x61c   :  { %v1676_v3 = vpop.f32.mrb[6].mxu0 }
 0x61d   :  { %v1309_v4 = vpop.f32.mrb[7].mxu0 }
 0x620   :  { %v733_v5 = vpop.f32.mrb[8].mxu0 }
 0x621   :  { %v737_v6 = vmul.f32 0.125, %v733_v5  ;;  %v1314_v7 = vpop.f32.mrb[9].mxu0 }
 0x623   :  { %v738_v8 = vadd.f32 %v1639_v32, %v737_v6 }
 0x625   :  { %v739_v9 = vsel %vm400_vm2, %v738_v8, -inf }
 0x626   :  { %740 = vmax.xlane.f32.xlu0 %v739_v9 }
 0x63c   :  { %825 = vrot.lane.b32.xlu0 %v1619_v21, %s1529_s1 }
 0x6b3   :  { %v741_v10 = vpop.xlane.xlu0 %740 }
 0x6b4   :  { %v742_v11 = vsub.f32 %v738_v8, %v741_v10 }
 0x6b6   :  { %v743_v12 = vmul.f32 1.442695, %v742_v11 }
 0x6b7   :  { %v826_v20 = vpop.permute.xlu0 %825 }
 0x6b8   :  { %1417 = vpow2.f32 %v743_v12 }
 0x6c2   :  { %v1418_v13 = vpop.eup %1417 }
 0x6c3   :  { %v745_v14 = vsel %vm400_vm2, %v1418_v13, 0.0 }
 0x6c4   :  { %746 = vadd.xlane.f32.xlu1 %v745_v14 }
 0x6d5   :  { %827 = vrot.lane.b32.xlu1 %v1622_v22, %s1529_s1 }
 0x751   :  { %v747_v15 = vpop.xlane.xlu1 %746 }
 0x752   :  { %1419 = vrcp.f32 %v747_v15 }
 0x755   :  { %v828_v19 = vpop.permute.xlu1 %827 }
 0x75c   :  { %v1420_v16 = vpop.eup %1419 }
 0x75d   :  { %v749_v17 = vmul.f32 %v1420_v16, %v1418_v13 }
 0x75f   :  { %751 = vst.msk [vmem:[#allocation8 + $0x10] sm:$0xff] %vm400_vm2, %v749_v17  ;;  %1318 = vmatmul.mubr.msk.f32.vlgmr.msra.gmra.mrb[10].mxu0 %vm400_vm2, %v749_v17 }
 0x760   :  { %1321 = vmatpush3.xpose.msk.msra.mxu0 %vm321_vm1, %v828_v19  ;;  %1322 = vmatprep.mubr.msk.f32.mxu0 %vm1533_vm0, %v1532_v18 }
 0x761   :  { %1325 = vmatprep.subr.mxu0 %v1532_v18 }
 0x763   :  { %1323 = vmatmul.mubr.msk.f32.vlgmr.msra.gmra.mrb[12].mxu0 %vm321_vm1, %v826_v20 }
 0x764   :  { %1327 = vmatprep.mubr.msk.f32.mxu0 %vm1533_vm0, %v1532_v18 }
 0x832   :  { %v821_v21 = vpop.f32.mrb[10].mxu0 }
 0x833   :  { %v1319_v22 = vpop.f32.mrb[11].mxu0 }
 0x836   :  { %v899_v23 = vpop.f32.mrb[12].mxu0 }
 0x837   :  { %v903_v24 = vmul.f32 0.125, %v899_v23  ;;  %v1324_v25 = vpop.f32.mrb[13].mxu0 }
 0x839   :  { %v904_v26 = vadd.f32 %v1639_v32, %v903_v24 }
 0x83b   :  { %v905_v27 = vsel %vm400_vm2, %v904_v26, -inf }
 0x83c   :  { %906 = vmax.xlane.f32.xlu1 %v905_v27 }
 0x84d   :  { %919 = vrot.lane.b32.xlu1 %v1644_v44, %s1529_s1  ;;  %v1408_v44 = vld [vmem:[#allocation5 + $0x38] sm:$0xff]  }
 0x8c9   :  { %v907_v28 = vpop.xlane.xlu1 %906 }
 0x8ca   :  { %v908_v29 = vsub.f32 %v904_v26, %v907_v28 }
 0x8cc   :  { %v909_v30 = vmul.f32 1.442695, %v908_v29 }
 0x8cd   :  { %v920_v31 = vpop.permute.xlu1 %919 }
 0x8ce   :  { %1421 = vpow2.f32 %v909_v30  ;;  %1326 = vmatpush3.msra.mxu0 %v920_v31 }
 0x8cf   :  { %1330 = vmatprep.subr.bf16.mxu0 %v1532_v18 }
 0x8d8   :  { %v1422_v33 = vpop.eup %1421 }
 0x8d9   :  { %v911_v34 = vsel %vm400_vm2, %v1422_v33, 0.0 }
 0x8da   :  { %912 = vadd.xlane.f32.xlu0 %v911_v34 }
 0x967   :  { %v913_v35 = vpop.xlane.xlu0 %912 }
 0x968   :  { %1423 = vrcp.f32 %v913_v35 }
 0x972   :  { %v1424_v32 = vpop.eup %1423 }
 0x973   :  { %v915_v36 = vmul.f32 %v1424_v32, %v1422_v33 }
 0x975   :  { %917 = vst.msk [vmem:[#allocation8 + $0x18] sm:$0xff] %vm400_vm2, %v915_v36  ;;  %1328 = vmatmul.mubr.msk.f32.vlgmr.msra.gmra.mrb[14].mxu0 %vm400_vm2, %v915_v36 }
 0x976   :  { %1346 = vmatprep.mubr.msk.bf16.mxu0 %vm1533_vm0, %v1532_v18  ;;  %1331 = vmatpush3.bf16.msra.mxu0 %v1401_v37 }
 0x977   :  { %1332 = vmatprep.subr.bf16.mxu0 %v1532_v18 }
 0x97a   :  { %1333 = vmatpush3.bf16.msra.mxu0 %v1402_v38 }
 0x97b   :  { %1334 = vmatprep.subr.bf16.mxu0 %v1532_v18 }
 0x97e   :  { %1335 = vmatpush3.bf16.msra.mxu0 %v1403_v39 }
 0x97f   :  { %1336 = vmatprep.subr.bf16.mxu0 %v1532_v18 }
 0x982   :  { %1337 = vmatpush3.bf16.msra.mxu0 %v1404_v40 }
 0x983   :  { %1338 = vmatprep.subr.bf16.mxu0 %v1532_v18 }
 0x986   :  { %1339 = vmatpush3.bf16.msra.mxu0 %v1405_v41 }
 0x987   :  { %1340 = vmatprep.subr.bf16.mxu0 %v1532_v18 }
 0x98a   :  { %1341 = vmatpush3.bf16.msra.mxu0 %v1406_v42 }
 0x98b   :  { %1342 = vmatprep.subr.bf16.mxu0 %v1532_v18 }
 0x98e   :  { %1343 = vmatpush3.bf16.msra.mxu0 %v1407_v43 }
 0x98f   :  { %1344 = vmatprep.subr.bf16.mxu0 %v1532_v18  ;;  %v1225_v18 = vld [vmem:[%s1758_s3] ss:$0 sm:$0xff]  ;;  %s1170_s3 = sshll.u32 %s1534_s13, 4  ;;  %s1171_s3 = int_to_ptr.vmem [resolvable:$true] %s1170_s3 }
 0x990   :  { %s1473_s14 = scalar_lea.vmem %s1171_s3, 512  ;;  %p1478_p3 = scmp.lt.s32.totalorder %s1171_s3, %s1171_s3 }
 0x991   :  { %p1474_p2 = scmp.ne.s32.totalorder %s1171_s3, %s1473_s14  ;;  %p1479_p4 = scmp.lt.s32.totalorder %s1473_s14, %s1473_s14 }
 0x992   :  { %1345 = vmatpush3.bf16.msra.mxu0 %v1408_v44 }
 0x993   :  { %p1480_p5 = por %p1479_p4, %p1478_p3 }
 0x995   :  { %p1481_p6 = pnand %p1480_p5, %p1474_p2 }
 0xa48   :  { %v991_v45 = vpop.f32.mrb[14].mxu0 }
 0xa49   :  { %v1363_v46 = vpack.i.bf16 %v991_v45, %v1676_v3  ;;  %v1329_v47 = vpop.f32.mrb[15].mxu0 }
 0xa4b   :  { %1364 = vrot.lane.b32.xlu0 %v1363_v46, %s1529_s1 }
 0xabd   :  { %v1365_v48 = vpop.permute.xlu0 %1364 }
 0xabe   :  { %v1367_v49 = vunpack.i.h.bf16 %v1365_v48  ;;  %v1366_v50 = vunpack.i.l.bf16 %v1365_v48 }
 0xac0   :  { %v999_v52 = vsel %vm321_vm1, %v821_v21, %v1367_v49  ;;  %v660_v53 = vsel %vm321_vm1, %v1656_v51, %v1366_v50 }
 0xac1   :  { %v1000_v54 = vpack.c.bf16 %v999_v52, %v660_v53 }
 0xac3   :  { %1347 = vmatmul.mubr.bf16.vlgmr.msra.gmra.mrb[16].mxu0 %v1000_v54 }
 0xb96   :  { %v1105_v55 = vpop.f32.mrb[16].mxu0 }
 0xb97   :  { %v1106_v56 = vadd.f32 %v1225_v18, %v1105_v55  ;;  %v1348_v57 = vpop.f32.mrb[17].mxu0 }
 0xb98   :  { %v1108_v58 = vpop.f32.mrb[18].mxu0 }
 0xb99   :  { %v1109_v59 = vadd.f32 %v1225_v18, %v1108_v58  ;;  %1112 = vadd.xlane.f32.xlu1 %v1106_v56  ;;  %v1349_v60 = vpop.f32.mrb[19].mxu0 }
 0xb9b   :  { %1114 = vadd.xlane.f32.xlu0 %v1109_v59 }
 0xc26   :  { %v1113_v61 = vpop.xlane.xlu1 %1112 }
 0xc27   :  { %v1117_v62 = vmul.f32 0.0078125, %v1113_v61 }
 0xc28   :  { %v1115_v63 = vpop.xlane.xlu0 %1114 }
 0xc29   :  { %v1119_v0 = vsub.f32 %v1106_v56, %v1117_v62  ;;  %v1118_v1 = vmul.f32 0.0078125, %v1115_v63 }
 0xc2b   :  { %v1120_v51 = vsub.f32 %v1109_v59, %v1118_v1  ;;  %v1121_v2 = vmul.f32 %v1119_v0, %v1119_v0 }
 0xc2d   :  { %1123 = vadd.xlane.f32.xlu1 %v1121_v2  ;;  %v1122_v3 = vmul.f32 %v1120_v51, %v1120_v51 }
 0xc31   :  { %1125 = vadd.xlane.f32.xlu1 %v1122_v3 }
 0xc32   :  { %1484 = shalt.err (!%p1481_p6)
}
 0xc33   :  { %s1485_s17 = scalar_lea.hbm %s1763_s8, 512 }
 0xc34   :  { %p1486_p7 = scmp.ne.s32.totalorder %s1763_s8, %s1485_s17  ;;  %p1489_p8 = scmp.lt.u32.totalorder %s1485_s17, %s1763_s8 }
 0xc36   :  { %p1491_p9 = pnand %p1489_p8, %p1486_p7 }
 0xc38   :  { %1494 = shalt.err (!%p1491_p9)
}
 0xc39   :  { %s1535_s22 = smov 128   ;;  %s1536_s23 = smov 8   ;;  %v1234_v11 = vld [vmem:[%s1759_s4] ss:$0 sm:$0xff] }
 0xc3a   :  { %1176 = dma.vmem_to_hbm [thread:$0]  %s1171_s3, 512, %s1763_s8, [#allocation9], %s1535_s22, %s1535_s22, %s1536_s23  }
 0xc3b   :  { %v1235_v13 = vld [vmem:[%s1760_s5] ss:$0 sm:$0xff]  ;;  %s1537_s8 = smov [#allocation7]  }
 0xc3c   :  { %s1158_s28 = sshll.u32 %s1537_s8, 4  ;;  %s1159_s28 = int_to_ptr.vmem [resolvable:$true] %s1158_s28 }
 0xc3d   :  { %s1495_s30 = scalar_lea.vmem %s1159_s28, 256  ;;  %p1500_p11 = scmp.lt.s32.totalorder %s1159_s28, %s1159_s28 }
 0xc3e   :  { %p1496_p10 = scmp.ne.s32.totalorder %s1159_s28, %s1495_s30  ;;  %p1501_p12 = scmp.lt.s32.totalorder %s1495_s30, %s1495_s30 }
 0xc40   :  { %p1502_p13 = por %p1501_p12, %p1500_p11 }
 0xc42   :  { %p1503_p0 = pnand %p1502_p13, %p1496_p10 }
 0xcba   :  { %v1124_v4 = vpop.xlane.xlu1 %1123 }
 0xcbb   :  { %v1127_v5 = vmul.f32 0.0078125, %v1124_v4 }
 0xcbd   :  { %v1129_v6 = vadd.f32 1e-05, %v1127_v5 }
 0xcbe   :  { %v1126_v7 = vpop.xlane.xlu1 %1125 }
 0xcbf   :  { %1425 = vrsqrt.f32 %v1129_v6  ;;  %v1128_v8 = vmul.f32 0.0078125, %v1126_v7 }
 0xcc1   :  { %v1130_v9 = vadd.f32 1e-05, %v1128_v8 }
 0xcc3   :  { %1427 = vrsqrt.f32 %v1130_v9 }
 0xcc9   :  { %v1426_v10 = vpop.eup %1425 }
 0xcca   :  { %v1133_v12 = vmul.f32 %v1426_v10, %v1119_v0 }
 0xccc   :  { %v1141_v14 = vmul.f32 %v1234_v11, %v1133_v12 }
 0xccd   :  { %v1428_v15 = vpop.eup %1427 }
 0xcce   :  { %v1134_v16 = vmul.f32 %v1428_v15, %v1120_v51  ;;  %v1149_v17 = vadd.f32 %v1235_v13, %v1141_v14 }
 0xcd0   :  { %v1142_v19 = vmul.f32 %v1234_v11, %v1134_v16  ;;  %1151 = vst [vmem:[#allocation7] sm:$0xff] %v1149_v17 }
 0xcd2   :  { %v1150_v20 = vadd.f32 %v1235_v13, %v1142_v19 }
 0xcd4   :  { %1152 = vst [vmem:[#allocation7 + $0x8] sm:$0xff] %v1150_v20 }
 0xcd5   :  { %1506 = shalt.err (!%p1503_p0)
}
 0xcd6   :  { %s1507_s9 = scalar_lea.hbm %s1762_s7, 256 }
 0xcd7   :  { %p1508_p1 = scmp.ne.s32.totalorder %s1762_s7, %s1507_s9  ;;  %p1511_p2 = scmp.lt.u32.totalorder %s1507_s9, %s1762_s7 }
 0xcd9   :  { %p1513_p3 = pnand %p1511_p2, %p1508_p1 }
 0xcdb   :  { %1516 = shalt.err (!%p1513_p3)
}
 0xcdc   :  { %1164 = dma.vmem_to_hbm [thread:$0]  %s1159_s28, 256, %s1762_s7, [#allocation4], %s1535_s22, %s1535_s22, %s1536_s23  }
 0xcdd   :  { %1521 = dma.done.wait [#allocation4], 256  }
 0xcde   :  { %1522 = vsyncadd [#allocation4], 4294967040 }
 0xcdf   :  { %1523 = dma.done.wait [#allocation9], 512  }
 0xce0   :  { %1524 = vsyncadd [#allocation9], 4294966784 }
 0xce1   :  { %1183 = vsyncpa [#allocation3], 1 }
 0xce2   :  { %1184 = vsyncpa [#allocation6], 1 }
 0xce3   :  { %1185 = vsyncpa [#allocation4], 1 }
 0xce4   :  { %1186 = vsyncpa [#allocation9], 1 }

</bundles_post_ra>
